<compile_context>
chip_gen: v7x
topology: tpu7x:2x2x1
jax: 0.10.0
libtpu: 0.0.40
codegen_flags: <defaults>
</compile_context>

<pallas_src>
import functools

import numpy as np
import jax
import jax.numpy as jnp
from jax import lax
from jax.experimental import pallas as pl
from jax.experimental.pallas import tpu as pltpu

EPS = 1e-5

# 3x3 tap offsets (oy, ox) = (dy-1, dx-1), dy-major / dx-minor so tap index
# k = dy*3 + dx matches the flattened PyTorch OIHW kernel order.
TAPS = tuple((oy, ox) for oy in (-1, 0, 1) for ox in (-1, 0, 1))


def _make_tap_masks(H, W):
    """(9, H*W) float32 validity masks implementing zero padding = 1."""
    hw = np.arange(H * W)
    h, w = hw // W, hw % W
    rows = []
    for oy, ox in TAPS:
        valid = ((h + oy >= 0) & (h + oy <= H - 1) &
                 (w + ox >= 0) & (w + ox <= W - 1))
        rows.append(valid.astype(np.float32))
    return jnp.asarray(np.stack(rows, axis=0))


# ----------------------------------------------------------------------------
# Pallas kernel: one fused odefunc evaluation on a (Bb, C, H*W) block
# ----------------------------------------------------------------------------
def _odefunc_kernel(
    x_ref, masks_ref,
    g1_ref, be1_ref, w1_ref, b1e_ref,
    g2_ref, be2_ref, w2_ref, b2e_ref,
    g3_ref, be3_ref,
    out_ref,
    *, Bb, C, G, H, W):
    HW = H * W
    cpg = C // G
    inv_cnt = 1.0 / float(cpg * HW)
    aligned = (C % 8 == 0)            # sublane-aligned channel count?

    masks = masks_ref[...]            # (9, HW) f32 zero-padding validity masks

    def group_sum(s):
        # (Bb, C, 1) per-channel sums -> per-group sums broadcast back per channel
        if cpg == 1:
            return s
        sg = jnp.sum(s.reshape(Bb, G, cpg, 1), axis=2, keepdims=True)
        sg = jnp.broadcast_to(sg, (Bb, G, cpg, 1))
        return sg.reshape(Bb, C, 1)

    def group_norm(v, g_ref, b_ref):
        # single-pass GroupNorm with the affine folded into one scale/shift pass
        mean = group_sum(jnp.sum(v, axis=2, keepdims=True)) * inv_cnt
        ex2 = group_sum(jnp.sum(v * v, axis=2, keepdims=True)) * inv_cnt
        var = jnp.maximum(ex2 - mean * mean, 0.0)
        scale = g_ref[...] * lax.rsqrt(var + EPS)         # (Bb, C, 1)
        shift = b_ref[...] - mean * scale                 # (Bb, C, 1)
        return v * scale + shift

    def concat_conv(v, w_ref, be_ref):
        # 3x3 conv, stride 1, zero pad 1 on v: (Bb, C, HW) f32.  The constant-t
        # channel + conv bias are pre-folded into be_ref (C, HW) by the wrapper.
        v2 = v.reshape(Bb * C, HW)                        # free when C % 8 == 0
        taps = []
        for k, (oy, ox) in enumerate(TAPS):
            d = oy * W + ox
            s = v2 if d == 0 else pltpu.roll(v2, shift=(-d) % HW, axis=1)
            s = s * masks[k:k + 1, :]                     # zero padding
            taps.append(s.astype(jnp.bfloat16) if aligned else s)
        wmat = w_ref[...]                                 # (C, 9C) bf16
        bias_eff = be_ref[...]                            # (C, HW) f32
        outs = []
        if aligned:
            # one (Bb, 9C, HW) bf16 im2col tensor; one MXU dot per image
            pat = jnp.concatenate([t.reshape(Bb, C, HW) for t in taps], axis=1)
            for b in range(Bb):
                outs.append(jnp.dot(wmat, pat[b],
                                    preferred_element_type=jnp.float32) + bias_eff)
        else:
            # unaligned C (toy config): f32 concat per image, cast at the operand
            for b in range(Bb):
                pat_b = jnp.concatenate(
                    [t[b * C:(b + 1) * C, :] for t in taps], axis=0)
                outs.append(jnp.dot(wmat, pat_b.astype(jnp.bfloat16),
                                    preferred_element_type=jnp.float32) + bias_eff)
        return jnp.stack(outs, axis=0)                    # (Bb, C, HW) f32

    h = group_norm(x_ref[...], g1_ref, be1_ref)
    h = jnp.maximum(h, 0.0)
    h = concat_conv(h, w1_ref, b1e_ref)
    h = group_norm(h, g2_ref, be2_ref)
    h = jnp.maximum(h, 0.0)
    h = concat_conv(h, w2_ref, b2e_ref)
    out_ref[...] = group_norm(h, g3_ref, be3_ref)


# ----------------------------------------------------------------------------
# Parameter repacking (PyTorch layout -> kernel-friendly matmul layout)
# ----------------------------------------------------------------------------
def prepare_params(P, C):
    f32 = jnp.float32

    def col(v):
        return v.reshape(C, 1).astype(f32)

    def conv_mats(w):
        # w: (C_out, C_in+1, 3, 3) with the t-channel at input index 0.
        w = w.astype(f32)
        # x-channel weights -> (C, 9*C) bf16, column index k*C + ci, k = dy*3+dx
        w_x = jnp.transpose(w[:, 1:, :, :], (0, 2, 3, 1)).reshape(C, 9 * C)
        w_x = w_x.astype(jnp.bfloat16)
        # t-channel weights -> (C, 9) f32 (folded into bias_eff in the wrapper)
        w_t = w[:, 0, :, :].reshape(C, 9)
        return w_x, w_t

    w1, wt1 = conv_mats(P["conv1_w"])
    w2, wt2 = conv_mats(P["conv2_w"])
    return dict(
        g1=col(P["gn1_w"]), be1=col(P["gn1_b"]),
        w1=w1, wt1=wt1, b1=col(P["conv1_b"]),
        g2=col(P["gn2_w"]), be2=col(P["gn2_b"]),
        w2=w2, wt2=wt2, b2=col(P["conv2_b"]),
        g3=col(P["gn3_w"]), be3=col(P["gn3_b"]),
    )


# ----------------------------------------------------------------------------
# batch_block auto-sizing: biggest per-step block under a VMEM budget, while
# keeping >= 2 grid steps so "parallel" batch sharding can use both v7x cores.
# ----------------------------------------------------------------------------
def _pick_batch_block(B, C, HW, budget_bytes=24 << 20):
    # rough per-sample live-VMEM estimate: double-buffered f32 in/out blocks,
    # 9 masked tap copies + im2col patches, a few f32 intermediates.
    per_sample = 80 * C * HW
    best_fit = 1
    best_fit_multi = None
    for bb in range(1, B + 1):
        if B % bb:
            continue
        if bb * per_sample > budget_bytes:
            break
        best_fit = bb
        if B // bb >= 2:
            best_fit_multi = bb
    return best_fit_multi if best_fit_multi is not None else best_fit


# ----------------------------------------------------------------------------
# Wrapper: builds the pallas_call (grid over batch, lane-dense H*W layout)
# ----------------------------------------------------------------------------
def make_odefunc_pallas(B, C, H, W, batch_block=None,
                        vmem_limit_bytes=48 * 1024 * 1024):
    G = min(32, C)
    assert C % G == 0
    HW = H * W
    if batch_block is None:
        batch_block = _pick_batch_block(B, C, HW)
    assert B % batch_block == 0
    nb = B // batch_block
    masks = _make_tap_masks(H, W)

    kernel = functools.partial(_odefunc_kernel, Bb=batch_block, C=C, G=G, H=H, W=W)

    x_map = lambda i: (i, 0, 0)     # batch-tiled
    cmap = lambda i: (0, 0)         # weights / masks / biases resident across grid

    call = pl.pallas_call(
        kernel,
        grid=(nb,),
        in_specs=[
            pl.BlockSpec((batch_block, C, HW), x_map),                    # x
            pl.BlockSpec((9, HW), cmap),                                  # pad masks
            pl.BlockSpec((C, 1), cmap), pl.BlockSpec((C, 1), cmap),       # gn1 gamma/beta
            pl.BlockSpec((C, 9 * C), cmap), pl.BlockSpec((C, HW), cmap),  # conv1 W(bf16), bias_eff
            pl.BlockSpec((C, 1), cmap), pl.BlockSpec((C, 1), cmap),       # gn2 gamma/beta
            pl.BlockSpec((C, 9 * C), cmap), pl.BlockSpec((C, HW), cmap),  # conv2 W(bf16), bias_eff
            pl.BlockSpec((C, 1), cmap), pl.BlockSpec((C, 1), cmap),       # gn3 gamma/beta
        ],
        out_specs=pl.BlockSpec((batch_block, C, HW), x_map),
        out_shape=jax.ShapeDtypeStruct((B, C, HW), jnp.float32),
        compiler_params=pltpu.CompilerParams(
            dimension_semantics=("parallel",),      # shard batch across cores
            vmem_limit_bytes=vmem_limit_bytes),
    )

    def f(t, x, kp):
        t = jnp.asarray(t, jnp.float32)
        x2 = x.astype(jnp.float32).reshape(B, C, HW)
        # constant-t channel is linear in t: fold it (via the pad masks) and the
        # conv bias into one resident (C, HW) effective-bias input per conv.
        b1e = jnp.dot(t * kp["wt1"], masks) + kp["b1"]
        b2e = jnp.dot(t * kp["wt2"], masks) + kp["b2"]
        out = call(
            x2, masks,
            kp["g1"], kp["be1"], kp["w1"], b1e,
            kp["g2"], kp["be2"], kp["w2"], b2e,
            kp["g3"], kp["be3"],
        )
        return out.reshape(B, C, H, W)

    return f


# ----------------------------------------------------------------------------
# Pure-JAX reference (for the numerical self-check)
# ----------------------------------------------------------------------------
def odefunc_ref(t, x, P):
    C = x.shape[1]
    G = min(32, C)

    def gn(v, w, b):
        Bb, Cc, Hh, Ww = v.shape
        cpg = Cc // G
        vg = v.reshape(Bb, G, cpg, Hh, Ww)
        mean = vg.mean(axis=(2, 3, 4), keepdims=True)
        var = ((vg - mean) ** 2).mean(axis=(2, 3, 4), keepdims=True)
        vn = ((vg - mean) * lax.rsqrt(var + EPS)).reshape(Bb, Cc, Hh, Ww)
        return vn * w[None, :, None, None] + b[None, :, None, None]

    def cconv(v, Wc, bias):
        Bb, Cc, Hh, Ww = v.shape
        tt = jnp.full((Bb, 1, Hh, Ww), t, v.dtype)
        ttx = jnp.concatenate([tt, v], axis=1)
        out = lax.conv_general_dilated(
            ttx, Wc, window_strides=(1, 1), padding=((1, 1), (1, 1)),
            dimension_numbers=("NCHW", "OIHW", "NCHW"),
            precision=lax.Precision.HIGHEST)
        return out + bias[None, :, None, None]

    h = gn(x, P["gn1_w"], P["gn1_b"])
    h = jax.nn.relu(h)
    h = cconv(h, P["conv1_w"], P["conv1_b"])
    h = gn(h, P["gn2_w"], P["gn2_b"])
    h = jax.nn.relu(h)
    h = cconv(h, P["conv2_w"], P["conv2_b"])
    h = gn(h, P["gn3_w"], P["gn3_b"])
    return h


# ----------------------------------------------------------------------------
# main
# ----------------------------------------------------------------------------
if __name__ == "__main__":
    B, C, H, W = 2, 4, 16, 16

    key = jax.random.PRNGKey(0)
    ks = jax.random.split(key, 8)

    def gn_init(k):
        k1, k2 = jax.random.split(k)
        return (1.0 + 0.1 * jax.random.normal(k1, (C,), jnp.float32),
                0.1 * jax.random.normal(k2, (C,), jnp.float32))

    def conv_init(k):
        k1, k2 = jax.random.split(k)
        fan_in = (C + 1) * 9
        w = jax.random.normal(k1, (C, C + 1, 3, 3), jnp.float32) / jnp.sqrt(fan_in)
        b = 0.05 * jax.random.normal(k2, (C,), jnp.float32)
        return w, b

    P = {}
    P["gn1_w"], P["gn1_b"] = gn_init(ks[0])
    P["conv1_w"], P["conv1_b"] = conv_init(ks[1])
    P["gn2_w"], P["gn2_b"] = gn_init(ks[2])
    P["conv2_w"], P["conv2_b"] = conv_init(ks[3])
    P["gn3_w"], P["gn3_b"] = gn_init(ks[4])

    x = jax.random.normal(ks[5], (B, C, H, W), jnp.float32)
    t = jnp.float32(0.5)

    kp = prepare_params(P, C)
    f_pallas = make_odefunc_pallas(B, C, H, W)          # batch_block auto-sized
    fwd = jax.jit(lambda tt, xx: f_pallas(tt, xx, kp))

    y = jax.block_until_ready(fwd(t, x))
    assert y.shape == (B, C, H, W) and y.dtype == jnp.float32

    y_ref = jax.block_until_ready(jax.jit(lambda tt, xx: odefunc_ref(tt, xx, P))(t, x))

    # Tolerance budgets bf16 matmul-operand rounding (f32 accumulation) across
    # the two conv layers + GroupNorm rescaling; real indexing/layout bugs
    # would produce O(0.1+) errors on these O(1) activations.
    if not bool(jnp.allclose(y, y_ref, rtol=3e-2, atol=3e-2)):
        max_err = float(jnp.max(jnp.abs(y - y_ref)))
        raise SystemExit(f"Pallas kernel mismatch vs reference, max|err|={max_err}")

    print("KERNEL_OK")
</pallas_src>

<mosaic_0001>
module attributes {stable_mosaic.version = 11 : i64} {
  func.func @_odefunc_kernel(%arg0: i32, %arg1: memref<1x4x256xf32, #tpu.memory_space<vmem>>, %arg2: memref<9x256xf32, #tpu.memory_space<vmem>>, %arg3: memref<4x1xf32, #tpu.memory_space<vmem>>, %arg4: memref<4x1xf32, #tpu.memory_space<vmem>>, %arg5: memref<4x36xbf16, #tpu.memory_space<vmem>>, %arg6: memref<4x256xf32, #tpu.memory_space<vmem>>, %arg7: memref<4x1xf32, #tpu.memory_space<vmem>>, %arg8: memref<4x1xf32, #tpu.memory_space<vmem>>, %arg9: memref<4x36xbf16, #tpu.memory_space<vmem>>, %arg10: memref<4x256xf32, #tpu.memory_space<vmem>>, %arg11: memref<4x1xf32, #tpu.memory_space<vmem>>, %arg12: memref<4x1xf32, #tpu.memory_space<vmem>>, %arg13: memref<1x4x256xf32, #tpu.memory_space<vmem>>) attributes {dimension_semantics = [#tpu.dimension_semantics<parallel>], iteration_bounds = array<i64: 2>, scalar_prefetch = 0 : i64, scratch_operands = 0 : i64, tpu.core_type = #tpu.core_type<tc>, window_params = [{transform_indices = @transform_0, window_bounds = array<i64: 1, 4, 256>}, {pipeline_mode = #tpu.pipeline_mode<synchronous>, transform_indices = @transform_1, window_bounds = array<i64: 9, 256>}, {pipeline_mode = #tpu.pipeline_mode<synchronous>, transform_indices = @transform_2, window_bounds = array<i64: 4, 1>}, {pipeline_mode = #tpu.pipeline_mode<synchronous>, transform_indices = @transform_3, window_bounds = array<i64: 4, 1>}, {pipeline_mode = #tpu.pipeline_mode<synchronous>, transform_indices = @transform_4, window_bounds = array<i64: 4, 36>}, {pipeline_mode = #tpu.pipeline_mode<synchronous>, transform_indices = @transform_5, window_bounds = array<i64: 4, 256>}, {pipeline_mode = #tpu.pipeline_mode<synchronous>, transform_indices = @transform_6, window_bounds = array<i64: 4, 1>}, {pipeline_mode = #tpu.pipeline_mode<synchronous>, transform_indices = @transform_7, window_bounds = array<i64: 4, 1>}, {pipeline_mode = #tpu.pipeline_mode<synchronous>, transform_indices = @transform_8, window_bounds = array<i64: 4, 36>}, {pipeline_mode = #tpu.pipeline_mode<synchronous>, transform_indices = @transform_9, window_bounds = array<i64: 4, 256>}, {pipeline_mode = #tpu.pipeline_mode<synchronous>, transform_indices = @transform_10, window_bounds = array<i64: 4, 1>}, {pipeline_mode = #tpu.pipeline_mode<synchronous>, transform_indices = @transform_11, window_bounds = array<i64: 4, 1>}, {transform_indices = @transform_12, window_bounds = array<i64: 1, 4, 256>}]} {
    %c0 = arith.constant 0 : index
    %c0_0 = arith.constant 0 : index
    %0 = vector.load %arg2[%c0, %c0_0] : memref<9x256xf32, #tpu.memory_space<vmem>>, vector<9x256xf32>
    %c0_1 = arith.constant 0 : index
    %c0_2 = arith.constant 0 : index
    %c0_3 = arith.constant 0 : index
    %1 = vector.load %arg1[%c0_1, %c0_2, %c0_3] : memref<1x4x256xf32, #tpu.memory_space<vmem>>, vector<1x4x256xf32>
    %cst = arith.constant dense<0.000000e+00> : vector<1x4xf32>
    %2 = vector.multi_reduction <add>, %1, %cst [2] : vector<1x4x256xf32> to vector<1x4xf32>
    %3 = vector.shape_cast %2 : vector<1x4xf32> to vector<1x4x1xf32>
    %cst_4 = arith.constant 3.906250e-03 : f32
    %4 = vector.broadcast %cst_4 : f32 to vector<1x4x1xf32>
    %5 = arith.mulf %3, %4 : vector<1x4x1xf32>
    %6 = arith.mulf %1, %1 : vector<1x4x256xf32>
    %cst_5 = arith.constant dense<0.000000e+00> : vector<1x4xf32>
    %7 = vector.multi_reduction <add>, %6, %cst_5 [2] : vector<1x4x256xf32> to vector<1x4xf32>
    %8 = vector.shape_cast %7 : vector<1x4xf32> to vector<1x4x1xf32>
    %cst_6 = arith.constant 3.906250e-03 : f32
    %9 = vector.broadcast %cst_6 : f32 to vector<1x4x1xf32>
    %10 = arith.mulf %8, %9 : vector<1x4x1xf32>
    %11 = arith.mulf %5, %5 : vector<1x4x1xf32>
    %12 = arith.subf %10, %11 : vector<1x4x1xf32>
    %cst_7 = arith.constant 0.000000e+00 : f32
    %13 = vector.broadcast %cst_7 : f32 to vector<1x4x1xf32>
    %14 = arith.maximumf %12, %13 : vector<1x4x1xf32>
    %c0_8 = arith.constant 0 : index
    %c0_9 = arith.constant 0 : index
    %15 = vector.load %arg3[%c0_8, %c0_9] : memref<4x1xf32, #tpu.memory_space<vmem>>, vector<4x1xf32>
    %cst_10 = arith.constant 9.99999974E-6 : f32
    %16 = vector.broadcast %cst_10 : f32 to vector<1x4x1xf32>
    %17 = arith.addf %14, %16 : vector<1x4x1xf32>
    %18 = math.rsqrt %17 : vector<1x4x1xf32>
    %19 = vector.shape_cast %15 : vector<4x1xf32> to vector<1x4x1xf32>
    %20 = arith.mulf %19, %18 : vector<1x4x1xf32>
    %c0_11 = arith.constant 0 : index
    %c0_12 = arith.constant 0 : index
    %21 = vector.load %arg4[%c0_11, %c0_12] : memref<4x1xf32, #tpu.memory_space<vmem>>, vector<4x1xf32>
    %22 = arith.mulf %5, %20 : vector<1x4x1xf32>
    %23 = vector.shape_cast %21 : vector<4x1xf32> to vector<1x4x1xf32>
    %24 = arith.subf %23, %22 : vector<1x4x1xf32>
    %25 = vector.broadcast %20 : vector<1x4x1xf32> to vector<1x4x256xf32>
    %26 = arith.mulf %1, %25 : vector<1x4x256xf32>
    %27 = vector.broadcast %24 : vector<1x4x1xf32> to vector<1x4x256xf32>
    %28 = arith.addf %26, %27 : vector<1x4x256xf32>
    %cst_13 = arith.constant 0.000000e+00 : f32
    %29 = vector.broadcast %cst_13 : f32 to vector<1x4x256xf32>
    %30 = arith.maximumf %28, %29 : vector<1x4x256xf32>
    %31 = vector.shape_cast %30 : vector<1x4x256xf32> to vector<4x256xf32>
    %c17_i32 = arith.constant 17 : i32
    %32 = tpu.dynamic_rotate %31 by %c17_i32 dim 1 : vector<4x256xf32>, i32 -> vector<4x256xf32>
    %33 = vector.extract_strided_slice %0 {offsets = [0, 0], sizes = [1, 256], strides = [1, 1]} : vector<9x256xf32> to vector<1x256xf32>
    %34 = vector.broadcast %33 : vector<1x256xf32> to vector<4x256xf32>
    %35 = arith.mulf %32, %34 : vector<4x256xf32>
    %c16_i32 = arith.constant 16 : i32
    %36 = tpu.dynamic_rotate %31 by %c16_i32 dim 1 : vector<4x256xf32>, i32 -> vector<4x256xf32>
    %37 = vector.extract_strided_slice %0 {offsets = [1, 0], sizes = [1, 256], strides = [1, 1]} : vector<9x256xf32> to vector<1x256xf32>
    %38 = vector.broadcast %37 : vector<1x256xf32> to vector<4x256xf32>
    %39 = arith.mulf %36, %38 : vector<4x256xf32>
    %c15_i32 = arith.constant 15 : i32
    %40 = tpu.dynamic_rotate %31 by %c15_i32 dim 1 : vector<4x256xf32>, i32 -> vector<4x256xf32>
    %41 = vector.extract_strided_slice %0 {offsets = [2, 0], sizes = [1, 256], strides = [1, 1]} : vector<9x256xf32> to vector<1x256xf32>
    %42 = vector.broadcast %41 : vector<1x256xf32> to vector<4x256xf32>
    %43 = arith.mulf %40, %42 : vector<4x256xf32>
    %c1_i32 = arith.constant 1 : i32
    %44 = tpu.dynamic_rotate %31 by %c1_i32 dim 1 : vector<4x256xf32>, i32 -> vector<4x256xf32>
    %45 = vector.extract_strided_slice %0 {offsets = [3, 0], sizes = [1, 256], strides = [1, 1]} : vector<9x256xf32> to vector<1x256xf32>
    %46 = vector.broadcast %45 : vector<1x256xf32> to vector<4x256xf32>
    %47 = arith.mulf %44, %46 : vector<4x256xf32>
    %48 = vector.extract_strided_slice %0 {offsets = [4, 0], sizes = [1, 256], strides = [1, 1]} : vector<9x256xf32> to vector<1x256xf32>
    %49 = vector.broadcast %48 : vector<1x256xf32> to vector<4x256xf32>
    %50 = arith.mulf %31, %49 : vector<4x256xf32>
    %c255_i32 = arith.constant 255 : i32
    %51 = tpu.dynamic_rotate %31 by %c255_i32 dim 1 : vector<4x256xf32>, i32 -> vector<4x256xf32>
    %52 = vector.extract_strided_slice %0 {offsets = [5, 0], sizes = [1, 256], strides = [1, 1]} : vector<9x256xf32> to vector<1x256xf32>
    %53 = vector.broadcast %52 : vector<1x256xf32> to vector<4x256xf32>
    %54 = arith.mulf %51, %53 : vector<4x256xf32>
    %c241_i32 = arith.constant 241 : i32
    %55 = tpu.dynamic_rotate %31 by %c241_i32 dim 1 : vector<4x256xf32>, i32 -> vector<4x256xf32>
    %56 = vector.extract_strided_slice %0 {offsets = [6, 0], sizes = [1, 256], strides = [1, 1]} : vector<9x256xf32> to vector<1x256xf32>
    %57 = vector.broadcast %56 : vector<1x256xf32> to vector<4x256xf32>
    %58 = arith.mulf %55, %57 : vector<4x256xf32>
    %c240_i32 = arith.constant 240 : i32
    %59 = tpu.dynamic_rotate %31 by %c240_i32 dim 1 : vector<4x256xf32>, i32 -> vector<4x256xf32>
    %60 = vector.extract_strided_slice %0 {offsets = [7, 0], sizes = [1, 256], strides = [1, 1]} : vector<9x256xf32> to vector<1x256xf32>
    %61 = vector.broadcast %60 : vector<1x256xf32> to vector<4x256xf32>
    %62 = arith.mulf %59, %61 : vector<4x256xf32>
    %c239_i32 = arith.constant 239 : i32
    %63 = tpu.dynamic_rotate %31 by %c239_i32 dim 1 : vector<4x256xf32>, i32 -> vector<4x256xf32>
    %64 = vector.extract_strided_slice %0 {offsets = [8, 0], sizes = [1, 256], strides = [1, 1]} : vector<9x256xf32> to vector<1x256xf32>
    %65 = vector.broadcast %64 : vector<1x256xf32> to vector<4x256xf32>
    %66 = arith.mulf %63, %65 : vector<4x256xf32>
    %c0_14 = arith.constant 0 : index
    %c0_15 = arith.constant 0 : index
    %67 = vector.load %arg5[%c0_14, %c0_15] : memref<4x36xbf16, #tpu.memory_space<vmem>>, vector<4x36xbf16>
    %c0_16 = arith.constant 0 : index
    %c0_17 = arith.constant 0 : index
    %68 = vector.load %arg6[%c0_16, %c0_17] : memref<4x256xf32, #tpu.memory_space<vmem>>, vector<4x256xf32>
    %69 = tpu.concatenate %35, %39, %43, %47, %50, %54, %58, %62, %66 in 0 : vector<4x256xf32>, vector<4x256xf32>, vector<4x256xf32>, vector<4x256xf32>, vector<4x256xf32>, vector<4x256xf32>, vector<4x256xf32>, vector<4x256xf32>, vector<4x256xf32> -> vector<36x256xf32>
    %70 = arith.truncf %69 : vector<36x256xf32> to vector<36x256xbf16>
    %cst_18 = arith.constant dense<0.000000e+00> : vector<4x256xf32>
    %71 = tpu.matmul %67, %70, %cst_18 {dimension_numbers = #tpu.dot_dimension_numbers<[1], [0], [0], [1], [0, 0, 1, 1], [], []>} : vector<4x36xbf16>, vector<36x256xbf16>, vector<4x256xf32> -> vector<4x256xf32>
    %72 = arith.addf %71, %68 : vector<4x256xf32>
    %73 = vector.shape_cast %72 : vector<4x256xf32> to vector<1x4x256xf32>
    %cst_19 = arith.constant dense<0.000000e+00> : vector<1x4xf32>
    %74 = vector.multi_reduction <add>, %73, %cst_19 [2] : vector<1x4x256xf32> to vector<1x4xf32>
    %75 = vector.shape_cast %74 : vector<1x4xf32> to vector<1x4x1xf32>
    %cst_20 = arith.constant 3.906250e-03 : f32
    %76 = vector.broadcast %cst_20 : f32 to vector<1x4x1xf32>
    %77 = arith.mulf %75, %76 : vector<1x4x1xf32>
    %78 = arith.mulf %73, %73 : vector<1x4x256xf32>
    %cst_21 = arith.constant dense<0.000000e+00> : vector<1x4xf32>
    %79 = vector.multi_reduction <add>, %78, %cst_21 [2] : vector<1x4x256xf32> to vector<1x4xf32>
    %80 = vector.shape_cast %79 : vector<1x4xf32> to vector<1x4x1xf32>
    %cst_22 = arith.constant 3.906250e-03 : f32
    %81 = vector.broadcast %cst_22 : f32 to vector<1x4x1xf32>
    %82 = arith.mulf %80, %81 : vector<1x4x1xf32>
    %83 = arith.mulf %77, %77 : vector<1x4x1xf32>
    %84 = arith.subf %82, %83 : vector<1x4x1xf32>
    %cst_23 = arith.constant 0.000000e+00 : f32
    %85 = vector.broadcast %cst_23 : f32 to vector<1x4x1xf32>
    %86 = arith.maximumf %84, %85 : vector<1x4x1xf32>
    %c0_24 = arith.constant 0 : index
    %c0_25 = arith.constant 0 : index
    %87 = vector.load %arg7[%c0_24, %c0_25] : memref<4x1xf32, #tpu.memory_space<vmem>>, vector<4x1xf32>
    %cst_26 = arith.constant 9.99999974E-6 : f32
    %88 = vector.broadcast %cst_26 : f32 to vector<1x4x1xf32>
    %89 = arith.addf %86, %88 : vector<1x4x1xf32>
    %90 = math.rsqrt %89 : vector<1x4x1xf32>
    %91 = vector.shape_cast %87 : vector<4x1xf32> to vector<1x4x1xf32>
    %92 = arith.mulf %91, %90 : vector<1x4x1xf32>
    %c0_27 = arith.constant 0 : index
    %c0_28 = arith.constant 0 : index
    %93 = vector.load %arg8[%c0_27, %c0_28] : memref<4x1xf32, #tpu.memory_space<vmem>>, vector<4x1xf32>
    %94 = arith.mulf %77, %92 : vector<1x4x1xf32>
    %95 = vector.shape_cast %93 : vector<4x1xf32> to vector<1x4x1xf32>
    %96 = arith.subf %95, %94 : vector<1x4x1xf32>
    %97 = vector.broadcast %92 : vector<1x4x1xf32> to vector<1x4x256xf32>
    %98 = arith.mulf %73, %97 : vector<1x4x256xf32>
    %99 = vector.broadcast %96 : vector<1x4x1xf32> to vector<1x4x256xf32>
    %100 = arith.addf %98, %99 : vector<1x4x256xf32>
    %cst_29 = arith.constant 0.000000e+00 : f32
    %101 = vector.broadcast %cst_29 : f32 to vector<1x4x256xf32>
    %102 = arith.maximumf %100, %101 : vector<1x4x256xf32>
    %103 = vector.shape_cast %102 : vector<1x4x256xf32> to vector<4x256xf32>
    %c17_i32_30 = arith.constant 17 : i32
    %104 = tpu.dynamic_rotate %103 by %c17_i32_30 dim 1 : vector<4x256xf32>, i32 -> vector<4x256xf32>
    %105 = vector.extract_strided_slice %0 {offsets = [0, 0], sizes = [1, 256], strides = [1, 1]} : vector<9x256xf32> to vector<1x256xf32>
    %106 = vector.broadcast %105 : vector<1x256xf32> to vector<4x256xf32>
    %107 = arith.mulf %104, %106 : vector<4x256xf32>
    %c16_i32_31 = arith.constant 16 : i32
    %108 = tpu.dynamic_rotate %103 by %c16_i32_31 dim 1 : vector<4x256xf32>, i32 -> vector<4x256xf32>
    %109 = vector.extract_strided_slice %0 {offsets = [1, 0], sizes = [1, 256], strides = [1, 1]} : vector<9x256xf32> to vector<1x256xf32>
    %110 = vector.broadcast %109 : vector<1x256xf32> to vector<4x256xf32>
    %111 = arith.mulf %108, %110 : vector<4x256xf32>
    %c15_i32_32 = arith.constant 15 : i32
    %112 = tpu.dynamic_rotate %103 by %c15_i32_32 dim 1 : vector<4x256xf32>, i32 -> vector<4x256xf32>
    %113 = vector.extract_strided_slice %0 {offsets = [2, 0], sizes = [1, 256], strides = [1, 1]} : vector<9x256xf32> to vector<1x256xf32>
    %114 = vector.broadcast %113 : vector<1x256xf32> to vector<4x256xf32>
    %115 = arith.mulf %112, %114 : vector<4x256xf32>
    %c1_i32_33 = arith.constant 1 : i32
    %116 = tpu.dynamic_rotate %103 by %c1_i32_33 dim 1 : vector<4x256xf32>, i32 -> vector<4x256xf32>
    %117 = vector.extract_strided_slice %0 {offsets = [3, 0], sizes = [1, 256], strides = [1, 1]} : vector<9x256xf32> to vector<1x256xf32>
    %118 = vector.broadcast %117 : vector<1x256xf32> to vector<4x256xf32>
    %119 = arith.mulf %116, %118 : vector<4x256xf32>
    %120 = vector.extract_strided_slice %0 {offsets = [4, 0], sizes = [1, 256], strides = [1, 1]} : vector<9x256xf32> to vector<1x256xf32>
    %121 = vector.broadcast %120 : vector<1x256xf32> to vector<4x256xf32>
    %122 = arith.mulf %103, %121 : vector<4x256xf32>
    %c255_i32_34 = arith.constant 255 : i32
    %123 = tpu.dynamic_rotate %103 by %c255_i32_34 dim 1 : vector<4x256xf32>, i32 -> vector<4x256xf32>
    %124 = vector.extract_strided_slice %0 {offsets = [5, 0], sizes = [1, 256], strides = [1, 1]} : vector<9x256xf32> to vector<1x256xf32>
    %125 = vector.broadcast %124 : vector<1x256xf32> to vector<4x256xf32>
    %126 = arith.mulf %123, %125 : vector<4x256xf32>
    %c241_i32_35 = arith.constant 241 : i32
    %127 = tpu.dynamic_rotate %103 by %c241_i32_35 dim 1 : vector<4x256xf32>, i32 -> vector<4x256xf32>
    %128 = vector.extract_strided_slice %0 {offsets = [6, 0], sizes = [1, 256], strides = [1, 1]} : vector<9x256xf32> to vector<1x256xf32>
    %129 = vector.broadcast %128 : vector<1x256xf32> to vector<4x256xf32>
    %130 = arith.mulf %127, %129 : vector<4x256xf32>
    %c240_i32_36 = arith.constant 240 : i32
    %131 = tpu.dynamic_rotate %103 by %c240_i32_36 dim 1 : vector<4x256xf32>, i32 -> vector<4x256xf32>
    %132 = vector.extract_strided_slice %0 {offsets = [7, 0], sizes = [1, 256], strides = [1, 1]} : vector<9x256xf32> to vector<1x256xf32>
    %133 = vector.broadcast %132 : vector<1x256xf32> to vector<4x256xf32>
    %134 = arith.mulf %131, %133 : vector<4x256xf32>
    %c239_i32_37 = arith.constant 239 : i32
    %135 = tpu.dynamic_rotate %103 by %c239_i32_37 dim 1 : vector<4x256xf32>, i32 -> vector<4x256xf32>
    %136 = vector.extract_strided_slice %0 {offsets = [8, 0], sizes = [1, 256], strides = [1, 1]} : vector<9x256xf32> to vector<1x256xf32>
    %137 = vector.broadcast %136 : vector<1x256xf32> to vector<4x256xf32>
    %138 = arith.mulf %135, %137 : vector<4x256xf32>
    %c0_38 = arith.constant 0 : index
    %c0_39 = arith.constant 0 : index
    %139 = vector.load %arg9[%c0_38, %c0_39] : memref<4x36xbf16, #tpu.memory_space<vmem>>, vector<4x36xbf16>
    %c0_40 = arith.constant 0 : index
    %c0_41 = arith.constant 0 : index
    %140 = vector.load %arg10[%c0_40, %c0_41] : memref<4x256xf32, #tpu.memory_space<vmem>>, vector<4x256xf32>
    %141 = tpu.concatenate %107, %111, %115, %119, %122, %126, %130, %134, %138 in 0 : vector<4x256xf32>, vector<4x256xf32>, vector<4x256xf32>, vector<4x256xf32>, vector<4x256xf32>, vector<4x256xf32>, vector<4x256xf32>, vector<4x256xf32>, vector<4x256xf32> -> vector<36x256xf32>
    %142 = arith.truncf %141 : vector<36x256xf32> to vector<36x256xbf16>
    %cst_42 = arith.constant dense<0.000000e+00> : vector<4x256xf32>
    %143 = tpu.matmul %139, %142, %cst_42 {dimension_numbers = #tpu.dot_dimension_numbers<[1], [0], [0], [1], [0, 0, 1, 1], [], []>} : vector<4x36xbf16>, vector<36x256xbf16>, vector<4x256xf32> -> vector<4x256xf32>
    %144 = arith.addf %143, %140 : vector<4x256xf32>
    %145 = vector.shape_cast %144 : vector<4x256xf32> to vector<1x4x256xf32>
    %cst_43 = arith.constant dense<0.000000e+00> : vector<1x4xf32>
    %146 = vector.multi_reduction <add>, %145, %cst_43 [2] : vector<1x4x256xf32> to vector<1x4xf32>
    %147 = vector.shape_cast %146 : vector<1x4xf32> to vector<1x4x1xf32>
    %cst_44 = arith.constant 3.906250e-03 : f32
    %148 = vector.broadcast %cst_44 : f32 to vector<1x4x1xf32>
    %149 = arith.mulf %147, %148 : vector<1x4x1xf32>
    %150 = arith.mulf %145, %145 : vector<1x4x256xf32>
    %cst_45 = arith.constant dense<0.000000e+00> : vector<1x4xf32>
    %151 = vector.multi_reduction <add>, %150, %cst_45 [2] : vector<1x4x256xf32> to vector<1x4xf32>
    %152 = vector.shape_cast %151 : vector<1x4xf32> to vector<1x4x1xf32>
    %cst_46 = arith.constant 3.906250e-03 : f32
    %153 = vector.broadcast %cst_46 : f32 to vector<1x4x1xf32>
    %154 = arith.mulf %152, %153 : vector<1x4x1xf32>
    %155 = arith.mulf %149, %149 : vector<1x4x1xf32>
    %156 = arith.subf %154, %155 : vector<1x4x1xf32>
    %cst_47 = arith.constant 0.000000e+00 : f32
    %157 = vector.broadcast %cst_47 : f32 to vector<1x4x1xf32>
    %158 = arith.maximumf %156, %157 : vector<1x4x1xf32>
    %c0_48 = arith.constant 0 : index
    %c0_49 = arith.constant 0 : index
    %159 = vector.load %arg11[%c0_48, %c0_49] : memref<4x1xf32, #tpu.memory_space<vmem>>, vector<4x1xf32>
    %cst_50 = arith.constant 9.99999974E-6 : f32
    %160 = vector.broadcast %cst_50 : f32 to vector<1x4x1xf32>
    %161 = arith.addf %158, %160 : vector<1x4x1xf32>
    %162 = math.rsqrt %161 : vector<1x4x1xf32>
    %163 = vector.shape_cast %159 : vector<4x1xf32> to vector<1x4x1xf32>
    %164 = arith.mulf %163, %162 : vector<1x4x1xf32>
    %c0_51 = arith.constant 0 : index
    %c0_52 = arith.constant 0 : index
    %165 = vector.load %arg12[%c0_51, %c0_52] : memref<4x1xf32, #tpu.memory_space<vmem>>, vector<4x1xf32>
    %166 = arith.mulf %149, %164 : vector<1x4x1xf32>
    %167 = vector.shape_cast %165 : vector<4x1xf32> to vector<1x4x1xf32>
    %168 = arith.subf %167, %166 : vector<1x4x1xf32>
    %169 = vector.broadcast %164 : vector<1x4x1xf32> to vector<1x4x256xf32>
    %170 = arith.mulf %145, %169 : vector<1x4x256xf32>
    %171 = vector.broadcast %168 : vector<1x4x1xf32> to vector<1x4x256xf32>
    %172 = arith.addf %170, %171 : vector<1x4x256xf32>
    %c0_53 = arith.constant 0 : index
    %c0_54 = arith.constant 0 : index
    %c0_55 = arith.constant 0 : index
    %173 = vector.load %arg13[%c0_53, %c0_54, %c0_55] : memref<1x4x256xf32, #tpu.memory_space<vmem>>, vector<1x4x256xf32>
    tpu.vector_store %arg13[%c0_53, %c0_54, %c0_55], %172 {strides = array<i32>} : memref<1x4x256xf32, #tpu.memory_space<vmem>>, vector<1x4x256xf32>,
    return
  }
  func.func @transform_0(%arg0: i32) -> (i32, i32, i32) {
    %c0_i32 = arith.constant 0 : i32
    %c0_i32_0 = arith.constant 0 : i32
    %c0_i32_1 = arith.constant 0 : i32
    return %arg0, %c0_i32, %c0_i32_0 : i32, i32, i32
  }
  func.func @transform_1(%arg0: i32) -> (i32, i32) {
    %c0_i32 = arith.constant 0 : i32
    %c0_i32_0 = arith.constant 0 : i32
    %c0_i32_1 = arith.constant 0 : i32
    return %c0_i32, %c0_i32_0 : i32, i32
  }
  func.func @transform_2(%arg0: i32) -> (i32, i32) {
    %c0_i32 = arith.constant 0 : i32
    %c0_i32_0 = arith.constant 0 : i32
    %c0_i32_1 = arith.constant 0 : i32
    return %c0_i32, %c0_i32_0 : i32, i32
  }
  func.func @transform_3(%arg0: i32) -> (i32, i32) {
    %c0_i32 = arith.constant 0 : i32
    %c0_i32_0 = arith.constant 0 : i32
    %c0_i32_1 = arith.constant 0 : i32
    return %c0_i32, %c0_i32_0 : i32, i32
  }
  func.func @transform_4(%arg0: i32) -> (i32, i32) {
    %c0_i32 = arith.constant 0 : i32
    %c0_i32_0 = arith.constant 0 : i32
    %c0_i32_1 = arith.constant 0 : i32
    return %c0_i32, %c0_i32_0 : i32, i32
  }
  func.func @transform_5(%arg0: i32) -> (i32, i32) {
    %c0_i32 = arith.constant 0 : i32
    %c0_i32_0 = arith.constant 0 : i32
    %c0_i32_1 = arith.constant 0 : i32
    return %c0_i32, %c0_i32_0 : i32, i32
  }
  func.func @transform_6(%arg0: i32) -> (i32, i32) {
    %c0_i32 = arith.constant 0 : i32
    %c0_i32_0 = arith.constant 0 : i32
    %c0_i32_1 = arith.constant 0 : i32
    return %c0_i32, %c0_i32_0 : i32, i32
  }
  func.func @transform_7(%arg0: i32) -> (i32, i32) {
    %c0_i32 = arith.constant 0 : i32
    %c0_i32_0 = arith.constant 0 : i32
    %c0_i32_1 = arith.constant 0 : i32
    return %c0_i32, %c0_i32_0 : i32, i32
  }
  func.func @transform_8(%arg0: i32) -> (i32, i32) {
    %c0_i32 = arith.constant 0 : i32
    %c0_i32_0 = arith.constant 0 : i32
    %c0_i32_1 = arith.constant 0 : i32
    return %c0_i32, %c0_i32_0 : i32, i32
  }
  func.func @transform_9(%arg0: i32) -> (i32, i32) {
    %c0_i32 = arith.constant 0 : i32
    %c0_i32_0 = arith.constant 0 : i32
    %c0_i32_1 = arith.constant 0 : i32
    return %c0_i32, %c0_i32_0 : i32, i32
  }
  func.func @transform_10(%arg0: i32) -> (i32, i32) {
    %c0_i32 = arith.constant 0 : i32
    %c0_i32_0 = arith.constant 0 : i32
    %c0_i32_1 = arith.constant 0 : i32
    return %c0_i32, %c0_i32_0 : i32, i32
  }
  func.func @transform_11(%arg0: i32) -> (i32, i32) {
    %c0_i32 = arith.constant 0 : i32
    %c0_i32_0 = arith.constant 0 : i32
    %c0_i32_1 = arith.constant 0 : i32
    return %c0_i32, %c0_i32_0 : i32, i32
  }
  func.func @transform_12(%arg0: i32) -> (i32, i32, i32) {
    %c0_i32 = arith.constant 0 : i32
    %c0_i32_0 = arith.constant 0 : i32
    %c0_i32_1 = arith.constant 0 : i32
    return %arg0, %c0_i32, %c0_i32_0 : i32, i32, i32
  }
}

</mosaic_0001>

<bundles_post_ra>
// kernel: _lambda_.1
= control target key start
LH: loop header
LB: loop body
LE: loop exit
PB: predicated region body
PF: predicated region fallthrough
CT: control target
= control target key end

     0   :  { %s1157_s21 = smov 0   ;;  %s1477_s0 = inlined_call_operand.vmem [shape: f32[2,4,256], index: 0, kind: input, shape index: {}]   ;;  %s1478_s1 = inlined_call_operand.vmem [shape: f32[9,256], index: 1, kind: input, shape index: {}]   ;;  %s1479_s2 = inlined_call_operand.vmem [shape: f32[4,1], index: 2, kind: input, shape index: {}]   ;;  %s1480_s3 = inlined_call_operand.vmem [shape: f32[4,1], index: 3, kind: input, shape index: {}]   ;;  %s1481_s4 = inlined_call_operand.vmem [shape: bf16[4,36], index: 4, kind: input, shape index: {}]   ;;  %s1482_s5 = inlined_call_operand.vmem [shape: f32[4,256], index: 5, kind: input, shape index: {}]   ;;  %s1483_s6 = inlined_call_operand.vmem [shape: f32[4,1], index: 6, kind: input, shape index: {}]   ;;  %s1484_s7 = inlined_call_operand.vmem [shape: f32[4,1], index: 7, kind: input, shape index: {}]   ;;  %s1485_s8 = inlined_call_operand.vmem [shape: bf16[4,36], index: 8, kind: input, shape index: {}]   ;;  %s1486_s9 = inlined_call_operand.vmem [shape: f32[4,256], index: 9, kind: input, shape index: {}]   ;;  %s1487_s10 = inlined_call_operand.vmem [shape: f32[4,1], index: 10, kind: input, shape index: {}]   ;;  %s1488_s11 = inlined_call_operand.vmem [shape: f32[4,1], index: 11, kind: input, shape index: {}]   ;;  %s1489_s12 = inlined_call_operand.vmem [shape: f32[2,4,256], index: 12, kind: output, shape index: {}]  }
   0x1 LB: > { %s1026_s22 = sadd.s32 4294967295, %s1080_s21   ;;  %p1030_p0 = scmp.ge.s32.totalorder %s1080_s21, 1  ;;  %s1080_s21 = sphi %s1157_s21, %s22_s21  }
   0x2   : > { %p362_p1 = scmp.lt.s32.totalorder %s1080_s21, 3 }
   0x4   : > { %p363_p2 = pnand %p1030_p0, %p362_p1 }
   0x5   : > { %p404_p3 = scmp.lt.s32.totalorder (!%p363_p2), %s1026_s22, 1  ;;  %vm423_vm0 = vcmask (!%p363_p2), 1043456   ;;  %v1082_v10 = vmov (!%p363_p2), 0   ;;  %v443_v19 = vld [vmem:[%s1479_s2] sm:$0xf] (!%p363_p2)  ;;  %v457_v27 = vlaneseq (!%p363_p2)  ;;  %s1084_s13 = smov (!%p363_p2), 1  }
   0x6   : > { %366 = sbr.rel (%p363_p2) target bundleno = 1692 (0x69c), region = 68  ;;  %1063 = vset.pattern.permute.xlu1 (!%p363_p2), %v1082_v10  ;;  %720 = vmatprep.mubr.bf16.mxu0 (!%p363_p2), %v1082_v10  ;;  %v447_v22 = vld [vmem:[%s1480_s3] sm:$0xf] (!%p363_p2)  ;;  %v1083_v25 = vmov (!%p363_p2), 839922192   ;;  %s1085_s14 = smov (!%p363_p2), 16  }
   0x7   : > { %1064 = vset.pattern.permute.xlu0 (!%p363_p2), %v1082_v10  ;;  %919 = vmatprep.mubr.bf16.mxu1 (!%p363_p2), %v1082_v10  ;;  %v455_v26 = vunpack.c.l.s4 (!%p363_p2), %v1083_v25  ;;  %v1183_v29 = vshrl.u32 (!%p363_p2), %v457_v27, 7  ;;  %s1086_s15 = smov (!%p363_p2), 17   ;;  %s1087_s16 = smov (!%p363_p2), 15   ;;  %v415_v43 = vld [vmem:[%s1478_s1] sm:$0xff] (!%p363_p2)  ;;  %v416_v44 = vld [vmem:[%s1478_s1 + $0x8] sm:$0xff] (!%p363_p2)  ;;  %v1215_v50 = vand.u32 (!%p363_p2), 127, %v457_v27 }
   0x8   : > { %s1088_s17 = smov (!%p363_p2), 127   ;;  %s1089_s18 = smov (!%p363_p2), 112   ;;  %vm681_vm9 = vcmask (!%p363_p2), 1041408   ;;  %vm677_vm10 = vcmask (!%p363_p2), 293888  }
   0x9   : > { %v456_v28 = vunpack.c.0.s8 (!%p363_p2), %v455_v26  ;;  %s1090_s19 = smov (!%p363_p2), 113   ;;  %s1091_s20 = smov (!%p363_p2), 111   ;;  %v552_v42 = vsub.s32 (!%p363_p2), 4, %v1183_v29  ;;  %v525_v51 = vsub.s32 (!%p363_p2), 2, %v1183_v29  ;;  %v572_v52 = vsub.s32 (!%p363_p2), 5, %v1183_v29 }
   0xa   : > { %v606_v54 = vsub.s32 (!%p363_p2), 7, %v1183_v29  ;;  %v508_v56 = vsub.s32 (!%p363_p2), 1, %v1183_v29  ;;  %v542_v57 = vsub.s32 (!%p363_p2), 3, %v1183_v29  ;;  %vm520_vm1 = vcmp.lt.s32.totalorder (!%p363_p2), %v1215_v50, 15 }
   0xb   : > { %v459_v30 = vsub.s32 (!%p363_p2), %v456_v28, %v1183_v29  ;;  %v1211_v46 = vrot.slane (!%p363_p2), %v415_v43, %v552_v42  ;;  %v1213_v47 = vrot.slane (!%p363_p2), %v416_v44, %v552_v42  ;;  %v1225_v58 = vrot.slane (!%p363_p2), %v415_v43, %v525_v51 }
   0xc   : > { %v1227_v59 = vrot.slane (!%p363_p2), %v416_v44, %v525_v51  ;;  %v491_v61 = vsub.s32 (!%p363_p2), 0, %v1183_v29  ;;  %vm567_vm2 = vcmp.lt.s32.totalorder (!%p363_p2), %v1215_v50, 127  ;;  %v1231_v62 = vrot.slane (!%p363_p2), %v415_v43, %v572_v52 }
   0xd   : > { %s1491_s22 = smov (!%p404_p3, %s1026_s22), 1  ;;  %v560_v53 = vcombine.low %v1211_v46, %v1213_v47  ;;  %v1233_v63 = vrot.slane %v416_v44, %v572_v52  ;;  %vm601_vm3 = vcmp.lt.s32.totalorder %v1215_v50, 112  ;;  %vm503_vm4 = vcmp.lt.s32.totalorder %v1215_v50, 16 }
   0xe   : > { %s1043_s23 = sshll.u32 %s1491_s22, 3  ;;  %vm537_vm5 = vcmp.lt.s32.totalorder %v1215_v50, 1  ;;  %vm486_vm6 = vcmp.lt.s32.totalorder %v1215_v50, 17  ;;  %vm584_vm7 = vcmp.lt.s32.totalorder %v1215_v50, 113  ;;  %vm618_vm8 = vcmp.lt.s32.totalorder %v1215_v50, 111 }
   0xf   : > { %s408_s26 = scalar_lea.vmem %s1477_s0, %s1043_s23  ;;  %v835_v50 = vld [vmem:[%s1485_s8] sm:$0x3]  ;;  %s413_s28 = scalar_lea.vmem %s1489_s12, %s1043_s23 }
  0x10   : > { %v419_v0 = vld [vmem:[%s408_s26] sm:$0xff] }
  0x11   : > { %v421_v1 = vcombine.high %v419_v0, %v419_v0  ;;  %v424_v2 = vsel %vm423_vm0, %v419_v0, 0.0  ;;  %v430_v3 = vmul.f32 %v419_v0, %v419_v0 }
  0x13   : > { %v425_v4 = vsel %vm423_vm0, %v421_v1, 0.0  ;;  %v432_v5 = vcombine.high %v430_v3, %v430_v3  ;;  %v434_v6 = vsel %vm423_vm0, %v430_v3, 0.0  ;;  %v1238_v1 = vrot.slane %v415_v43, %v606_v54 }
  0x14   : > { %v426_v7 = vadd.f32 %v425_v4, %v424_v2  ;;  %v1240_v2 = vrot.slane %v416_v44, %v606_v54  ;;  %v1243_v4 = vrot.slane %v415_v43, %v508_v56 }
  0x15   : > { %v435_v8 = vsel %vm423_vm0, %v432_v5, 0.0  ;;  %v1245_v5 = vrot.slane %v416_v44, %v508_v56 }
  0x16   : > { %427 = vadd.xlane.f32.xlu0 %v426_v7  ;;  %v436_v9 = vadd.f32 %v435_v8, %v434_v6  ;;  %v1248_v6 = vrot.slane %v415_v43, %v542_v57  ;;  %v1250_v7 = vrot.slane %v416_v44, %v542_v57  ;;  %v1253_v8 = vrot.slane %v415_v43, %v491_v61 }
  0x1a   : > { %437 = vadd.xlane.f32.xlu0 %v436_v9  ;;  %v1255_v9 = vrot.slane %v416_v44, %v491_v61 }
  0xa3   : > { %v428_v11 = vpop.xlane.xlu0 %427 }
  0xa4   : > { %v429_v12 = vmul.f32 0.00390625, %v428_v11 }
  0xa6   : > { %v440_v14 = vmul.f32 %v429_v12, %v429_v12 }
  0xa7   : > { %v438_v13 = vpop.xlane.xlu0 %437 }
  0xa8   : > { %v439_v15 = vmul.f32 0.00390625, %v438_v13 }
  0xaa   : > { %v441_v16 = vsub.f32 %v439_v15, %v440_v14 }
  0xac   : > { %v442_v17 = vmax.f32 %v441_v16, 0.0 }
  0xae   : > { %v444_v18 = vadd.f32 1e-05, %v442_v17 }
  0xb0   : > { %1068 = vrsqrt.f32 %v444_v18 }
  0xba   : > { %v1069_v20 = vpop.eup %1068 }
  0xbb   : > { %v446_v21 = vmul.f32 %v1069_v20, %v443_v19 }
  0xbd   : > { %452 = vperm.xlu1 %1063, %v446_v21   ;;  %v448_v23 = vmul.f32 %v446_v21, %v429_v12  ;;  %v589_v12 = vsub.s32 6, %v1183_v29 }
  0xbf   : > { %v449_v24 = vsub.f32 %v447_v22, %v448_v23  ;;  %v1285_v29 = vrot.slane %v415_v43, %v589_v12 }
  0xc1   : > { %465 = vperm.xlu1 %1063, %v449_v24  }
 0x13c   : > { %v453_v31 = vpop.permute.xlu1 %452 }
 0x13d   : > { %v460_v32 = vrot.slane %v453_v31, %v459_v30 }
 0x13f   : > { %v462_v34 = vmul.f32 %v460_v32, %v419_v0 }
 0x140   : > { %v466_v33 = vpop.permute.xlu1 %465 }
 0x141   : > { %v473_v35 = vrot.slane %v466_v33, %v459_v30  ;;  %v1287_v30 = vrot.slane %v416_v44, %v589_v12 }
 0x143   : > { %v475_v36 = vadd.f32 %v473_v35, %v462_v34 }
 0x145   : > { %v476_v37 = vmax.f32 %v475_v36, 0.0 }
 0x147   : > { %533 = vrot.lane.b32.xlu1 %v476_v37, %s1084_s13  ;;  %499 = vrot.lane.b32.xlu0 %v476_v37, %s1085_s14  ;;  %v478_v38 = vcombine.high %v476_v37, %v476_v37  ;;  %v1235_v0 = vmul.f32 %v560_v53, %v476_v37 }
 0x149   : > { %v646_v51 = vcombine.high %v1235_v0, %v1235_v0 }
 0x14b   : > { %480 = vrot.lane.b32.xlu1 %v476_v37, %s1086_s15  ;;  %518 = vrot.lane.b32.xlu0 %v478_v38, %s1087_s16 }
 0x14f   : > { %516 = vrot.lane.b32.xlu1 %v476_v37, %s1087_s16  ;;  %565 = vrot.lane.b32.xlu0 %v478_v38, %s1088_s17 }
 0x153   : > { %563 = vrot.lane.b32.xlu1 %v476_v37, %s1088_s17  ;;  %599 = vrot.lane.b32.xlu0 %v478_v38, %s1089_s18 }
 0x157   : > { %597 = vrot.lane.b32.xlu1 %v476_v37, %s1089_s18  ;;  %582 = vrot.lane.b32.xlu0 %v478_v38, %s1090_s19 }
 0x15b   : > { %616 = vrot.lane.b32.xlu0 %v478_v38, %s1091_s20  ;;  %501 = vrot.lane.b32.xlu1 %v478_v38, %s1085_s14 }
 0x15f   : > { %535 = vrot.lane.b32.xlu1 %v478_v38, %s1084_s13 }
 0x163   : > { %482 = vrot.lane.b32.xlu1 %v478_v38, %s1086_s15 }
 0x167   : > { %580 = vrot.lane.b32.xlu1 %v476_v37, %s1090_s19 }
 0x16b   : > { %614 = vrot.lane.b32.xlu1 %v476_v37, %s1091_s20 }
 0x1b9   : > { %v534_v39 = vpop.permute.xlu1 %533  ;;  %v500_v41 = vpop.permute.xlu0 %499 }
 0x1bd   : > { %v1202_v40 = vpop.permute.xlu1 %480  ;;  %v519_v48 = vpop.permute.xlu0 %518 }
 0x1c1   : > { %v517_v45 = vpop.permute.xlu1 %516  ;;  %v566_v60 = vpop.permute.xlu0 %565 }
 0x1c2   : > { %v521_v13 = vsel %vm520_vm1, %v517_v45, %v519_v48  ;;  %v522_v14 = vsel %vm520_vm1, %v519_v48, %v517_v45 }
 0x1c3   : > { %v531_v31 = vmul.f32 %v1225_v58, %v522_v14  ;;  %v532_v32 = vmul.f32 %v1227_v59, %v521_v13  ;;  %v1317_v13 = vld [vmem:[%s1478_s1 + $0x10] ss:$0 sm:$0xff]  ;;  %v1322_v14 = vld [vmem:[%s1478_s1 + $0x18] ss:$0 sm:$0xff] }
 0x1c5   : > { %v564_v49 = vpop.permute.xlu1 %563  ;;  %v600_v17 = vpop.permute.xlu0 %599 }
 0x1c6   : > { %v568_v15 = vsel %vm567_vm2, %v564_v49, %v566_v60  ;;  %v569_v16 = vsel %vm567_vm2, %v566_v60, %v564_v49 }
 0x1c7   : > { %v578_v27 = vmul.f32 %v1231_v62, %v568_v15  ;;  %v579_v28 = vmul.f32 %v1233_v63, %v569_v16 }
 0x1c9   : > { %v598_v55 = vpop.permute.xlu1 %597  ;;  %v650_v48 = vrot.slane %v578_v27, 4  ;;  %v651_v49 = vrot.slane %v579_v28, 4 }
 0x1ca   : > { %v602_v19 = vsel %vm601_vm3, %v598_v55, %v600_v17  ;;  %v603_v20 = vsel %vm601_vm3, %v600_v17, %v598_v55 }
 0x1cb   : > { %v612_v36 = vmul.f32 %v1238_v1, %v602_v19  ;;  %v613_v37 = vmul.f32 %v1240_v2, %v603_v20  ;;  %v665_v17 = vsel %vm423_vm0, %v646_v51, %v651_v49  ;;  %v664_v19 = vsel %vm423_vm0, %v1235_v0, %v650_v48 }
 0x1cd   : > { %v502_v3 = vpop.permute.xlu1 %501 }
 0x1ce   : > { %v504_v10 = vsel %vm503_vm4, %v500_v41, %v502_v3  ;;  %v505_v11 = vsel %vm503_vm4, %v502_v3, %v500_v41  ;;  %v583_v41 = vpop.permute.xlu0 %582  ;;  %v656_v3 = vrot.slane %v612_v36, 4 }
 0x1cf   : > { %v514_v23 = vmul.f32 %v1243_v4, %v505_v11  ;;  %v515_v24 = vmul.f32 %v1245_v5, %v504_v10  ;;  %v657_v10 = vrot.slane %v613_v37, 4 }
 0x1d1   : > { %v536_v18 = vpop.permute.xlu1 %535  ;;  %v635_v42 = vrot.slane %v514_v23, 4  ;;  %v636_v43 = vrot.slane %v515_v24, 4 }
 0x1d2   : > { %v538_v21 = vsel %vm537_vm5, %v534_v39, %v536_v18  ;;  %v539_v22 = vsel %vm537_vm5, %v536_v18, %v534_v39  ;;  %v617_v15 = vpop.permute.xlu0 %616 }
 0x1d3   : > { %v548_v25 = vmul.f32 %v1248_v6, %v539_v22  ;;  %v549_v26 = vmul.f32 %v1250_v7, %v538_v21 }
 0x1d5   : > { %v641_v33 = vrot.slane %v548_v25, 4  ;;  %v642_v34 = vrot.slane %v549_v26, 4  ;;  %v483_v35 = vpop.permute.xlu1 %482 }
 0x1d6   : > { %v487_v38 = vsel %vm486_vm6, %v1202_v40, %v483_v35  ;;  %v488_v39 = vsel %vm486_vm6, %v483_v35, %v1202_v40 }
 0x1d7   : > { %v497_v44 = vmul.f32 %v1253_v8, %v488_v39  ;;  %v498_v45 = vmul.f32 %v1255_v9, %v487_v38  ;;  %v663_v54 = vsel %vm423_vm0, %v532_v32, %v642_v34  ;;  %v662_v55 = vsel %vm423_vm0, %v531_v31, %v641_v33  ;;  %v631_v31 = vld [vmem:[%s1481_s4] sm:$0x3] }
 0x1d8   : > { %v632_v32 = vld [vmem:[%s1482_s5] sm:$0xff] }
 0x1d9   : > { %v581_v52 = vpop.permute.xlu1 %580  ;;  %v661_v53 = vsel %vm423_vm0, %v498_v45, %v636_v43  ;;  %v660_v40 = vsel %vm423_vm0, %v497_v44, %v635_v42  ;;  %v675_v33 = vcombine.high %v632_v32, %v632_v32 }
 0x1da   : > { %v585_v56 = vsel %vm584_vm7, %v581_v52, %v583_v41  ;;  %v586_v57 = vsel %vm584_vm7, %v583_v41, %v581_v52  ;;  %v669_v60 = vpack.c.bf16 %v663_v54, %v661_v53  ;;  %v668_v61 = vpack.c.bf16 %v662_v55, %v660_v40 }
 0x1db   : > { %v595_v11 = vmul.f32 %v1285_v29, %v585_v56  ;;  %v596_v12 = vmul.f32 %v1287_v30, %v586_v57 }
 0x1dc   : > { %688 = vmatprep.subr.bf16.mxu0 %v669_v60 }
 0x1dd   : > { %689 = vmatpush1.bf16.msra.mxu0 %v668_v61  ;;  %v615_v16 = vpop.permute.xlu1 %614  ;;  %v667_v18 = vsel %vm423_vm0, %v596_v12, %v657_v10  ;;  %v666_v20 = vsel %vm423_vm0, %v595_v11, %v656_v3  ;;  %v746_v61 = vld [vmem:[%s1483_s6] sm:$0xf] }
 0x1de   : > { %v619_v21 = vsel %vm618_vm8, %v615_v16, %v617_v15  ;;  %v620_v22 = vsel %vm618_vm8, %v617_v15, %v615_v16  ;;  %v671_v23 = vpack.c.bf16 %v667_v18, %v665_v17  ;;  %v670_v24 = vpack.c.bf16 %v666_v20, %v664_v19  ;;  %v750_v11 = vld [vmem:[%s1484_s7] sm:$0xf] }
 0x1df   : > { %v629_v25 = vmul.f32 %v1317_v13, %v619_v21  ;;  %v630_v26 = vmul.f32 %v1322_v14, %v620_v22 }
 0x1e0   : > { %690 = vmatprep.subr.bf16.mxu0 %v671_v23 }
 0x1e1   : > { %v672_v27 = vpack.c.bf16 %v629_v25, %v629_v25  ;;  %v673_v28 = vpack.c.bf16 %v630_v26, %v630_v26  ;;  %691 = vmatpush1.bf16.msra.mxu0 %v670_v24 }
 0x1e3   : > { %1037 = vmatprep.subr.msk.bf16.mxu0 %vm681_vm9, %v673_v28  ;;  %v683_v0 = vsel %vm681_vm9, %v672_v27, 0 }
 0x1e5   : > { %693 = vmatpush1.bf16.msra.mxu0 %v683_v0 }
 0x1e8   : > { %1038 = vmatmul.mubr.msk.bf16.vlgmr.msra.gmra.mrb[0].mxu0 %vm677_vm10, %v631_v31 }
 0x2bb   : > { %v722_v34 = vpop.f32.mrb[0].mxu0 }
 0x2bc   : > { %v723_v35 = vadd.f32 %v722_v34, %v632_v32  ;;  %v724_v36 = vpop.f32.mrb[1].mxu0 }
 0x2bd   : > { %v725_v37 = vadd.f32 %v724_v36, %v675_v33  ;;  %v726_v38 = vpop.f32.mrb[2].mxu0 }
 0x2be   : > { %v727_v39 = vpop.f32.mrb[3].mxu0  ;;  %v729_v41 = vsel %vm423_vm0, %v723_v35, 0.0  ;;  %v735_v42 = vmul.f32 %v723_v35, %v723_v35 }
 0x2bf   : > { %v730_v43 = vsel %vm423_vm0, %v725_v37, 0.0  ;;  %v736_v44 = vmul.f32 %v725_v37, %v725_v37 }
 0x2c0   : > { %v731_v45 = vadd.f32 %v730_v43, %v729_v41  ;;  %v737_v48 = vsel %vm423_vm0, %v735_v42, 0.0 }
 0x2c1   : > { %v738_v49 = vsel %vm423_vm0, %v736_v44, 0.0 }
 0x2c2   : > { %732 = vadd.xlane.f32.xlu1 %v731_v45  ;;  %v739_v51 = vadd.f32 %v738_v49, %v737_v48 }
 0x2c4   : > { %740 = vadd.xlane.f32.xlu0 %v739_v51 }
 0x34f   : > { %v733_v52 = vpop.xlane.xlu1 %732 }
 0x350   : > { %v734_v53 = vmul.f32 0.00390625, %v733_v52 }
 0x351   : > { %v741_v54 = vpop.xlane.xlu0 %740 }
 0x352   : > { %v743_v40 = vmul.f32 %v734_v53, %v734_v53  ;;  %v742_v55 = vmul.f32 0.00390625, %v741_v54 }
 0x354   : > { %v744_v56 = vsub.f32 %v742_v55, %v743_v40 }
 0x356   : > { %v745_v57 = vmax.f32 %v744_v56, 0.0 }
 0x358   : > { %v747_v60 = vadd.f32 1e-05, %v745_v57 }
 0x35a   : > { %1070 = vrsqrt.f32 %v747_v60 }
 0x364   : > { %v1071_v3 = vpop.eup %1070 }
 0x365   : > { %v749_v10 = vmul.f32 %v1071_v3, %v746_v61 }
 0x367   : > { %755 = vperm.xlu0 %1064, %v749_v10   ;;  %v751_v12 = vmul.f32 %v749_v10, %v734_v53 }
 0x369   : > { %v752_v15 = vsub.f32 %v750_v11, %v751_v12 }
 0x36b   : > { %762 = vperm.xlu1 %1063, %v752_v15  }
 0x3e6   : > { %v756_v16 = vpop.permute.xlu0 %755 }
 0x3e7   : > { %v758_v17 = vmul.f32 %v756_v16, %v723_v35  ;;  %v759_v19 = vmul.f32 %v756_v16, %v725_v37 }
 0x3ea   : > { %v763_v18 = vpop.permute.xlu1 %762 }
 0x3eb   : > { %v765_v20 = vadd.f32 %v763_v18, %v758_v17  ;;  %v766_v21 = vadd.f32 %v763_v18, %v759_v19 }
 0x3ed   : > { %v1354_v22 = vmax.f32 %v765_v20, 0.0  ;;  %v1360_v23 = vmax.f32 %v766_v21, 0.0 }
 0x3ef   : > { %785 = vrot.lane.b32.xlu0 %v1354_v22, %s1087_s16  ;;  %777 = vrot.lane.b32.xlu1 %v1354_v22, %s1085_s14  ;;  %v802_v21 = vmul.f32 %v1360_v23, %v1213_v47 }
 0x3f3   : > { %803 = vrot.lane.b32.xlu0 %v1354_v22, %s1088_s17  ;;  %779 = vrot.lane.b32.xlu1 %v1360_v23, %s1085_s14 }
 0x3f7   : > { %819 = vrot.lane.b32.xlu0 %v1354_v22, %s1089_s18  ;;  %793 = vrot.lane.b32.xlu1 %v1354_v22, %s1084_s13 }
 0x3fb   : > { %811 = vrot.lane.b32.xlu0 %v1354_v22, %s1090_s19  ;;  %795 = vrot.lane.b32.xlu1 %v1360_v23, %s1084_s13 }
 0x3ff   : > { %827 = vrot.lane.b32.xlu0 %v1354_v22, %s1091_s20  ;;  %769 = vrot.lane.b32.xlu1 %v1354_v22, %s1086_s15 }
 0x403   : > { %771 = vrot.lane.b32.xlu1 %v1360_v23, %s1086_s15 }
 0x407   : > { %787 = vrot.lane.b32.xlu1 %v1360_v23, %s1087_s16 }
 0x40b   : > { %805 = vrot.lane.b32.xlu1 %v1360_v23, %s1088_s17 }
 0x40f   : > { %821 = vrot.lane.b32.xlu1 %v1360_v23, %s1089_s18 }
 0x413   : > { %813 = vrot.lane.b32.xlu1 %v1360_v23, %s1090_s19 }
 0x417   : > { %829 = vrot.lane.b32.xlu1 %v1360_v23, %s1091_s20 }
 0x461   : > { %v778_v24 = vpop.permute.xlu1 %777  ;;  %v786_v28 = vpop.permute.xlu0 %785 }
 0x465   : > { %v780_v25 = vpop.permute.xlu1 %779  ;;  %v804_v41 = vpop.permute.xlu0 %803 }
 0x466   : > { %v781_v31 = vsel %vm503_vm4, %v778_v24, %v780_v25  ;;  %v782_v32 = vsel %vm503_vm4, %v780_v25, %v778_v24  ;;  %v801_v24 = vmul.f32 %v1354_v22, %v1211_v46 }
 0x467   : > { %v783_v36 = vmul.f32 %v782_v32, %v1243_v4  ;;  %v784_v37 = vmul.f32 %v781_v31, %v1245_v5 }
 0x469   : > { %v794_v26 = vpop.permute.xlu1 %793  ;;  %v839_v49 = vrot.slane %v783_v36, 4  ;;  %v840_v4 = vrot.slane %v784_v37, 4 }
 0x46d   : > { %v796_v27 = vpop.permute.xlu1 %795 }
 0x46e   : > { %v797_v33 = vsel %vm537_vm5, %v794_v26, %v796_v27  ;;  %v798_v34 = vsel %vm537_vm5, %v796_v27, %v794_v26 }
 0x46f   : > { %v799_v42 = vmul.f32 %v798_v34, %v1248_v6  ;;  %v800_v43 = vmul.f32 %v797_v33, %v1250_v7  ;;  %v820_v7 = vpop.permute.xlu0 %819 }
 0x471   : > { %v770_v0 = vpop.permute.xlu1 %769  ;;  %v845_v52 = vrot.slane %v799_v42, 4  ;;  %v846_v53 = vrot.slane %v800_v43, 4 }
 0x473   : > { %v812_v15 = vpop.permute.xlu0 %811 }
 0x475   : > { %v772_v35 = vpop.permute.xlu1 %771 }
 0x476   : > { %v773_v38 = vsel %vm486_vm6, %v770_v0, %v772_v35  ;;  %v774_v39 = vsel %vm486_vm6, %v772_v35, %v770_v0 }
 0x477   : > { %v775_v44 = vmul.f32 %v774_v39, %v1253_v8  ;;  %v776_v45 = vmul.f32 %v773_v38, %v1255_v9  ;;  %v828_v27 = vpop.permute.xlu0 %827 }
 0x479   : > { %v788_v48 = vpop.permute.xlu1 %787  ;;  %v862_v8 = vsel %vm423_vm0, %v776_v45, %v840_v4  ;;  %v861_v55 = vsel %vm423_vm0, %v775_v44, %v839_v49 }
 0x47a   : > { %v789_v5 = vsel %vm520_vm1, %v786_v28, %v788_v48  ;;  %v790_v51 = vsel %vm520_vm1, %v788_v48, %v786_v28 }
 0x47b   : > { %v791_v54 = vmul.f32 %v790_v51, %v1225_v58  ;;  %v792_v6 = vmul.f32 %v789_v5, %v1227_v59 }
 0x47d   : > { %v806_v40 = vpop.permute.xlu1 %805  ;;  %v864_v9 = vsel %vm423_vm0, %v792_v6, %v846_v53  ;;  %v863_v56 = vsel %vm423_vm0, %v791_v54, %v845_v52 }
 0x47e   : > { %v807_v57 = vsel %vm567_vm2, %v804_v41, %v806_v40  ;;  %v808_v60 = vsel %vm567_vm2, %v806_v40, %v804_v41  ;;  %v870_v61 = vpack.c.bf16 %v864_v9, %v862_v8  ;;  %v869_v58 = vpack.c.bf16 %v863_v56, %v861_v55  ;;  %v945_v56 = vld [vmem:[%s1487_s10] sm:$0xf] }
 0x47f   : > { %v809_v59 = vmul.f32 %v807_v57, %v1231_v62  ;;  %v810_v3 = vmul.f32 %v808_v60, %v1233_v63 }
 0x480   : > { %887 = vmatprep.subr.bf16.mxu1 %v870_v61  ;;  %v949_v61 = vld [vmem:[%s1488_s11] sm:$0xf] }
 0x481   : > { %888 = vmatpush1.bf16.msra.mxu1 %v869_v58  ;;  %v822_v10 = vpop.permute.xlu1 %821  ;;  %v851_v18 = vrot.slane %v809_v59, 4  ;;  %v852_v19 = vrot.slane %v810_v3, 4 }
 0x482   : > { %v823_v11 = vsel %vm601_vm3, %v820_v7, %v822_v10  ;;  %v824_v12 = vsel %vm601_vm3, %v822_v10, %v820_v7 }
 0x483   : > { %v825_v16 = vmul.f32 %v823_v11, %v1238_v1  ;;  %v826_v17 = vmul.f32 %v824_v12, %v1240_v2  ;;  %v866_v0 = vsel %vm423_vm0, %v802_v21, %v852_v19  ;;  %v865_v32 = vsel %vm423_vm0, %v801_v24, %v851_v18 }
 0x485   : > { %v814_v20 = vpop.permute.xlu1 %813  ;;  %v857_v25 = vrot.slane %v825_v16, 4  ;;  %v858_v26 = vrot.slane %v826_v17, 4 }
 0x486   : > { %v815_v62 = vsel %vm584_vm7, %v812_v15, %v814_v20  ;;  %v816_v63 = vsel %vm584_vm7, %v814_v20, %v812_v15 }
 0x487   : > { %v817_v1 = vmul.f32 %v815_v62, %v1285_v29  ;;  %v818_v2 = vmul.f32 %v816_v63, %v1287_v30 }
 0x489   : > { %v830_v28 = vpop.permute.xlu1 %829  ;;  %v868_v31 = vsel %vm423_vm0, %v818_v2, %v858_v26  ;;  %v867_v33 = vsel %vm423_vm0, %v817_v1, %v857_v25 }
 0x48a   : > { %v831_v47 = vsel %vm618_vm8, %v828_v27, %v830_v28  ;;  %v832_v46 = vsel %vm618_vm8, %v830_v28, %v828_v27  ;;  %v872_v22 = vpack.c.bf16 %v868_v31, %v866_v0  ;;  %v871_v29 = vpack.c.bf16 %v867_v33, %v865_v32 }
 0x48b   : > { %v833_v30 = vmul.f32 %v1317_v13, %v831_v47  ;;  %v834_v23 = vmul.f32 %v1322_v14, %v832_v46  ;;  %v836_v13 = vld [vmem:[%s1486_s9] sm:$0xff] }
 0x48c   : > { %889 = vmatprep.subr.bf16.mxu1 %v872_v22  ;;  %v876_v14 = vcombine.high %v836_v13, %v836_v13 }
 0x48d   : > { %v873_v34 = vpack.c.bf16 %v833_v30, %v833_v30  ;;  %v874_v35 = vpack.c.bf16 %v834_v23, %v834_v23  ;;  %890 = vmatpush1.bf16.msra.mxu1 %v871_v29 }
 0x48f   : > { %1039 = vmatprep.subr.msk.bf16.mxu1 %vm681_vm9, %v874_v35  ;;  %v882_v36 = vsel %vm681_vm9, %v873_v34, 0 }
 0x491   : > { %892 = vmatpush1.bf16.msra.mxu1 %v882_v36 }
 0x494   : > { %1040 = vmatmul.mubr.msk.bf16.vlgmr.msra.gmra.mrb[0].mxu1 %vm677_vm10, %v835_v50 }
 0x567   : > { %v921_v37 = vpop.f32.mrb[0].mxu1 }
 0x568   : > { %v922_v38 = vadd.f32 %v921_v37, %v836_v13  ;;  %v923_v39 = vpop.f32.mrb[1].mxu1 }
 0x569   : > { %v924_v41 = vadd.f32 %v923_v39, %v876_v14  ;;  %v925_v42 = vpop.f32.mrb[2].mxu1 }
 0x56a   : > { %v926_v43 = vpop.f32.mrb[3].mxu1  ;;  %v928_v44 = vsel %vm423_vm0, %v922_v38, 0.0  ;;  %v934_v45 = vmul.f32 %v922_v38, %v922_v38 }
 0x56b   : > { %v929_v48 = vsel %vm423_vm0, %v924_v41, 0.0  ;;  %v935_v49 = vmul.f32 %v924_v41, %v924_v41 }
 0x56c   : > { %v930_v4 = vadd.f32 %v929_v48, %v928_v44  ;;  %v936_v5 = vsel %vm423_vm0, %v934_v45, 0.0 }
 0x56d   : > { %v937_v51 = vsel %vm423_vm0, %v935_v49, 0.0 }
 0x56e   : > { %931 = vadd.xlane.f32.xlu0 %v930_v4  ;;  %v938_v52 = vadd.f32 %v937_v51, %v936_v5 }
 0x570   : > { %939 = vadd.xlane.f32.xlu1 %v938_v52 }
 0x5fb   : > { %v932_v53 = vpop.xlane.xlu0 %931 }
 0x5fc   : > { %v933_v54 = vmul.f32 0.00390625, %v932_v53 }
 0x5fd   : > { %v940_v6 = vpop.xlane.xlu1 %939 }
 0x5fe   : > { %v942_v7 = vmul.f32 %v933_v54, %v933_v54  ;;  %v941_v40 = vmul.f32 0.00390625, %v940_v6 }
 0x600   : > { %v943_v8 = vsub.f32 %v941_v40, %v942_v7 }
 0x602   : > { %v944_v9 = vmax.f32 %v943_v8, 0.0 }
 0x604   : > { %v946_v55 = vadd.f32 1e-05, %v944_v9 }
 0x606   : > { %1072 = vrsqrt.f32 %v946_v55 }
 0x610   : > { %v1073_v57 = vpop.eup %1072 }
 0x611   : > { %v948_v60 = vmul.f32 %v1073_v57, %v945_v56 }
 0x613   : > { %954 = vperm.xlu0 %1064, %v948_v60   ;;  %v950_v58 = vmul.f32 %v948_v60, %v933_v54 }
 0x615   : > { %v951_v59 = vsub.f32 %v949_v61, %v950_v58 }
 0x617   : > { %961 = vperm.xlu1 %1063, %v951_v59  }
 0x692   : > { %v955_v3 = vpop.permute.xlu0 %954 }
 0x693   : > { %v957_v10 = vmul.f32 %v955_v3, %v922_v38  ;;  %v958_v11 = vmul.f32 %v955_v3, %v924_v41 }
 0x696   : > { %v962_v12 = vpop.permute.xlu1 %961 }
 0x697   : > { %v964_v15 = vadd.f32 %v962_v12, %v957_v10  ;;  %v965_v16 = vadd.f32 %v962_v12, %v958_v11 }
 0x699   : > { %v968_v17 = vcombine.low %v964_v15, %v965_v16 }
 0x69b   : > { %970 = vst [vmem:[%s413_s28] sm:$0xff] %v968_v17 }
 0x69c PF: > { %s22_s21 = sadd.s32 1, %s1080_s21  }
 0x69d   : > { %p19_p4 = scmp.ge.s32.totalorder %s22_s21, 4  }
 0x69f   :  { %21 = sbr.rel (!%p19_p4) target bundleno = 1 (0x1), region = 98 }

</bundles_post_ra>
